<compile_context>
chip_gen: v7x
topology: tpu7x:2x2x1
jax: 0.10.0
libtpu: 0.0.40
codegen_flags: <defaults>
</compile_context>

<pallas_src>
import jax
import jax.numpy as jnp
from jax.experimental import pallas as pl
from jax.experimental.pallas import tpu as pltpu


def _softmax_kernel(w_ref, o_ref):
    # w_ref, o_ref: (1, N) float32, fully resident in VMEM (N small -> 1 vreg).
    w = w_ref[...]
    m = jnp.max(w, axis=-1, keepdims=True)            # stable softmax shift
    e = jnp.exp(w - m)
    s = jnp.sum(e, axis=-1, keepdims=True)
    o_ref[...] = e * pl.reciprocal(s, approx=False)   # exact: 1e-6 tolerance


@jax.jit
def color_matching_forward(weights: jax.Array) -> jax.Array:
    """Equivalent of ColorMatchingModel.forward(): softmax over the paint axis.

    weights: (num_paints,) float32
    returns: (num_paints,) float32 concentrations summing to 1.
    """
    num_paints = weights.shape[0]
    # 2-D view for TPU vector layout; reshape is metadata-only under jit.
    w2d = weights.astype(jnp.float32).reshape(1, num_paints)

    out = pl.pallas_call(
        _softmax_kernel,
        out_shape=jax.ShapeDtypeStruct((1, num_paints), jnp.float32),
        # Gridless: the whole (1, num_paints) array is one VMEM block.
        in_specs=[pl.BlockSpec(memory_space=pltpu.MemorySpace.VMEM)],
        out_specs=pl.BlockSpec(memory_space=pltpu.MemorySpace.VMEM),
    )(w2d)

    return out.reshape(num_paints)


def init_color_matching_params(num_paints: int) -> jax.Array:
    """Deterministic init matching nn.Parameter(th.full((num_paints,), 1/num_paints))."""
    return jnp.full((num_paints,), 1.0 / num_paints, dtype=jnp.float32)


if __name__ == "__main__":
    num_paints = 8

    # Deterministic parameters: same init as the PyTorch module, plus a small
    # fixed-PRNG perturbation so the softmax is exercised on non-uniform values.
    key = jax.random.PRNGKey(0)
    base = init_color_matching_params(num_paints)
    weights = base + 0.1 * jax.random.normal(key, (num_paints,), dtype=jnp.float32)

    concentrations = color_matching_forward(weights)
    concentrations = jax.block_until_ready(concentrations)

    # Reference check against plain-JAX softmax.
    ref = jax.nn.softmax(weights, axis=0)
    assert concentrations.shape == (num_paints,)
    assert jnp.allclose(concentrations, ref, atol=1e-6, rtol=1e-6)
    assert jnp.allclose(jnp.sum(concentrations), 1.0, atol=1e-6)

    print("KERNEL_OK")
</pallas_src>

<mosaic_0001>
module attributes {stable_mosaic.version = 11 : i64} {
  func.func @_softmax_kernel(%arg0: memref<1x8xf32, #tpu.memory_space<vmem>>, %arg1: memref<1x8xf32, #tpu.memory_space<vmem>>) attributes {dimension_semantics = [], scalar_prefetch = 0 : i64, scratch_operands = 0 : i64, tpu.core_type = #tpu.core_type<tc>} {
    %c0 = arith.constant 0 : index
    %c0_0 = arith.constant 0 : index
    %0 = vector.load %arg0[%c0, %c0_0] : memref<1x8xf32, #tpu.memory_space<vmem>>, vector<1x8xf32>
    %cst = arith.constant dense<0xFF800000> : vector<1xf32>
    %1 = vector.multi_reduction <maximumf>, %0, %cst [1] : vector<1x8xf32> to vector<1xf32>
    %2 = vector.shape_cast %1 : vector<1xf32> to vector<1x1xf32>
    %3 = vector.broadcast %2 : vector<1x1xf32> to vector<1x8xf32>
    %4 = arith.subf %0, %3 : vector<1x8xf32>
    %5 = math.exp %4 : vector<1x8xf32>
    %cst_1 = arith.constant dense<0.000000e+00> : vector<1xf32>
    %6 = vector.multi_reduction <add>, %5, %cst_1 [1] : vector<1x8xf32> to vector<1xf32>
    %7 = vector.shape_cast %6 : vector<1xf32> to vector<1x1xf32>
    %8 = tpu.reciprocal %7 : vector<1x1xf32> -> vector<1x1xf32>
    %9 = vector.broadcast %8 : vector<1x1xf32> to vector<1x8xf32>
    %10 = arith.mulf %5, %9 : vector<1x8xf32>
    %c0_2 = arith.constant 0 : index
    %c0_3 = arith.constant 0 : index
    %11 = vector.load %arg1[%c0_2, %c0_3] : memref<1x8xf32, #tpu.memory_space<vmem>>, vector<1x8xf32>
    tpu.vector_store %arg1[%c0_2, %c0_3], %10 {strides = array<i32>} : memref<1x8xf32, #tpu.memory_space<vmem>>, vector<1x8xf32>,
    return
  }
}

</mosaic_0001>

<bundles_post_ra>
// kernel: color_matching_forward.1
= control target key start
LH: loop header
LB: loop body
LE: loop exit
PB: predicated region body
PF: predicated region fallthrough
CT: control target
= control target key end

     0   :  { %vm10_vm0 = vcmask 57344   ;;  %s95_s0 = inlined_call_operand.vmem [shape: f32[1,8], index: 0, kind: input, shape index: {}]   ;;  %s96_s1 = inlined_call_operand.hbm [shape: f32[1,8], index: 1, kind: output, shape index: {}]  }
   0x1   :  { %v9_v0 = vld [vmem:[%s95_s0] sm:$0x1] }
   0x2   :  { %6 = vsyncpa [#allocation3], 0  ;;  %v11_v1 = vsel %vm10_vm0, %v9_v0, -inf  ;;  %s66_s8 = smov [#allocation2]  }
   0x3   :  { %12 = vmax.xlane.f32.xlu0 %v11_v1  ;;  %s29_s9 = sshll.u32 %s66_s8, 4  ;;  %s30_s9 = int_to_ptr.vmem [resolvable:$true] %s29_s9 }
   0x4   :  { %s42_s0 = scalar_lea.vmem %s30_s9, 16  ;;  %s46_s10 = scalar_lea.vmem %s30_s9, 32 }
   0x5   :  { %p43_p0 = scmp.ne.s32.totalorder %s30_s9, %s42_s0  ;;  %p47_p1 = scmp.lt.s32.totalorder %s30_s9, %s30_s9 }
   0x6   :  { %p48_p2 = scmp.lt.s32.totalorder %s46_s10, %s42_s0 }
   0x8   :  { %p49_p3 = por %p48_p2, %p47_p1 }
   0xa   :  { %p50_p4 = pnand %p49_p3, %p43_p0 }
  0x90   :  { %v13_v2 = vpop.xlane.xlu0 %12 }
  0x91   :  { %v14_v3 = vsub.f32 %v9_v0, %v13_v2 }
  0x93   :  { %v15_v4 = vmul.f32 1.442695, %v14_v3 }
  0x95   :  { %38 = vpow2.f32 %v15_v4 }
  0x9f   :  { %v39_v5 = vpop.eup %38 }
  0xa0   :  { %v17_v6 = vsel %vm10_vm0, %v39_v5, 0.0 }
  0xa1   :  { %18 = vadd.xlane.f32.xlu0 %v17_v6 }
 0x12e   :  { %v19_v7 = vpop.xlane.xlu0 %18 }
 0x12f   :  { %40 = vrcp.f32 %v19_v7 }
 0x139   :  { %v41_v8 = vpop.eup %40 }
 0x13a   :  { %v21_v9 = vmul.f32 %v41_v8, %v39_v5 }
 0x13c   :  { %22 = vst.msk [vmem:[#allocation2] sm:$0x1] %vm10_vm0, %v21_v9 }
 0x13d   :  { %53 = shalt.err (!%p50_p4)
}
 0x13e   :  { %s54_s13 = scalar_lea.hbm %s96_s1, 16 }
 0x13f   :  { %p55_p5 = scmp.ne.s32.totalorder %s96_s1, %s54_s13  ;;  %p58_p6 = scmp.lt.u32.totalorder %s54_s13, %s96_s1 }
 0x141   :  { %p60_p7 = pnand %p58_p6, %p55_p5 }
 0x143   :  { %63 = shalt.err (!%p60_p7)
}
 0x144   :  { %32 = dma.vmem_to_hbm [thread:$0]  %s30_s9, 16, %s96_s1, [#allocation3]  }
 0x145   :  { %64 = dma.done.wait [#allocation3], 16  }
 0x146   :  { %65 = vsyncadd [#allocation3], 4294967280 }
 0x147   :  { %36 = vsyncpa [#allocation3], 1 }

</bundles_post_ra>
